<compile_context>
chip_gen: v7x
topology: tpu7x:2x2x1
jax: 0.10.0
libtpu: 0.0.40
codegen_flags: <defaults>
</compile_context>

<pallas_src>
import jax
import jax.numpy as jnp
from jax.experimental import pallas as pl
from jax.experimental.pallas import tpu as pltpu


def _round_up(x, m):
    return ((x + m - 1) // m) * m


def _vmem_capacity_bytes():
    """Physical VMEM of the local TPU; conservative 64 MiB fallback (v7x size)."""
    try:
        return int(pltpu.get_tpu_info().vmem_capacity_bytes)
    except Exception:
        return 64 * 1024 * 1024


def _choose_tile_m(N, Kp, Dp, in_itemsize, out_itemsize, budget_bytes, sublane):
    """Largest N-tile whose buffers fit the VMEM budget, capped for pipelining.

    Resident (Kp, Dp) weight + bias are counted double-buffered (the default
    pipeline allocates two buffers even for a constant index map); the streamed
    x tile and out tile are double-buffered per row.
    """
    resident = 2 * Kp * Dp * in_itemsize + 2 * Dp * 4
    per_row = 2 * (Kp * in_itemsize + Dp * out_itemsize)
    tm = (budget_bytes - resident) // per_row
    tm = min(int(tm), 1024)                          # HBM roofline saturates ~512-1024
    tm = min(tm, _round_up(-(-N // 4), 128))         # >=4 grid steps (v7x: 2 TCs)
    tm = min(tm, _round_up(N, sublane))              # never bigger than (padded) N
    if tm >= 128:
        tm = (tm // 128) * 128                       # lane/sublane friendly
    else:
        tm = (tm // sublane) * sublane               # bf16: multiple of 16
    return int(max(tm, sublane))


def _patch_embed_kernel(x_ref, w_ref, b_ref, o_ref):
    # (tm, K) @ (K, D) on the MXU, f32 accumulate, f32 bias add, cast to out dtype.
    acc = jnp.dot(x_ref[...], w_ref[...], preferred_element_type=jnp.float32)
    o_ref[...] = (acc + b_ref[...]).astype(o_ref.dtype)


def patch_embed_pallas(x_nchw, conv_weight, conv_bias, patch_size, *,
                       compute_dtype=jnp.bfloat16, return_nchw=True):
    """Equivalent of nn.Conv2d(C, D, kernel_size=P, stride=P)(x_nchw).

    x_nchw:        (B, C, H, W)
    conv_weight:   (D, C, P, P)   PyTorch conv weight layout
    conv_bias:     (D,)
    compute_dtype: streamed-operand dtype (default bf16; set None to keep the
                   input dtype).  Accumulation and bias add are always f32.
    return_nchw:   True  -> (B, D, H//P, W//P)  (exact nn.Conv2d semantics)
                   False -> (B, num_patches, D) (transformer-ready, lane-dense D)
    """
    B, C, H, W = x_nchw.shape
    D = conv_weight.shape[0]
    P = patch_size
    assert H % P == 0 and W % P == 0
    gh, gw = H // P, W // P
    N, K = B * gh * gw, C * P * P
    out_dtype = x_nchw.dtype

    # Cast BEFORE the glue transpose so the transpose moves half the bytes.
    if compute_dtype is not None:
        x_nchw = x_nchw.astype(compute_dtype)
        conv_weight = conv_weight.astype(compute_dtype)

    # --- glue: patch extraction (reshape/transpose only; see TODO above) ---
    x_patches = (
        x_nchw.reshape(B, C, gh, P, gw, P)
        .transpose(0, 2, 4, 1, 3, 5)
        .reshape(N, K)
    )
    w = conv_weight.reshape(D, K).T                     # (K, D)
    b = conv_bias.reshape(1, D).astype(jnp.float32)

    # --- alignment: pad K/D to 128-multiples ONLY when needed (real ViT: no pads) ---
    Kp, Dp = _round_up(K, 128), _round_up(D, 128)
    if Kp != K:
        # Zero-fill is required on the contraction dim for correctness.
        x_patches = jnp.pad(x_patches, ((0, 0), (0, Kp - K)))
        w = jnp.pad(w, ((0, Kp - K), (0, 0)))
    if Dp != D:
        w = jnp.pad(w, ((0, 0), (0, Dp - D)))
        b = jnp.pad(b, ((0, 0), (0, Dp - D)))

    in_itemsize = jnp.dtype(x_patches.dtype).itemsize
    out_itemsize = jnp.dtype(out_dtype).itemsize
    sublane = 32 // max(in_itemsize, 1)                  # 8 f32, 16 bf16, 32 int8/fp8

    # --- VMEM budget: single hedge against per-chip capacity ---
    vmem_cap = _vmem_capacity_bytes()
    vmem_limit = min(vmem_cap - (8 << 20), 120 << 20)    # headroom for Mosaic scratch
    budget = vmem_limit - (2 << 20)
    tm = _choose_tile_m(N, Kp, Dp, in_itemsize, out_itemsize, budget, sublane)
    grid_m = pl.cdiv(N, tm)                              # ragged last tile masked by Pallas

    cost = pl.CostEstimate(
        flops=2 * N * Kp * Dp,
        bytes_accessed=(N * Kp * in_itemsize + Kp * Dp * in_itemsize
                        + N * Dp * out_itemsize + Dp * 4),
        transcendentals=0,
    )

    out = pl.pallas_call(
        _patch_embed_kernel,
        out_shape=jax.ShapeDtypeStruct((N, Dp), out_dtype),
        grid_spec=pltpu.PrefetchScalarGridSpec(
            num_scalar_prefetch=0,
            grid=(grid_m,),
            in_specs=[
                pl.BlockSpec((tm, Kp), lambda n: (n, 0)),   # streams over N
                pl.BlockSpec((Kp, Dp), lambda n: (0, 0)),   # weight resident in VMEM
                pl.BlockSpec((1, Dp), lambda n: (0, 0)),    # bias resident (f32)
            ],
            out_specs=pl.BlockSpec((tm, Dp), lambda n: (n, 0)),
        ),
        compiler_params=pltpu.CompilerParams(
            # K is untiled -> no reduction grid axis -> N tiles shard across
            # both TensorCores on v7x; harmless on v5e/v6e.
            dimension_semantics=("parallel",),
            vmem_limit_bytes=int(vmem_limit),
        ),
        cost_estimate=cost,
    )(x_patches, w, b)

    if Dp != D:
        out = out[:, :D]                         # drop D alignment padding only
    seq = out.reshape(B, gh * gw, D)             # (B, num_patches, D), lane-dense D
    if not return_nchw:
        return seq
    return seq.reshape(B, gh, gw, D).transpose(0, 3, 1, 2)


if __name__ == "__main__":
    # Small shapes consistent with PatchEmbed: img=16, patch=4, C=4, D=32, B=2.
    B, C, H, W = 2, 4, 16, 16
    P = 4
    embed_dim = 32

    key = jax.random.PRNGKey(0)
    kx, kw, kb = jax.random.split(key, 3)

    x = jax.random.normal(kx, (B, C, H, W), dtype=jnp.float32)
    conv_weight = jax.random.normal(kw, (embed_dim, C, P, P), dtype=jnp.float32) * 0.02
    conv_bias = jax.random.normal(kb, (embed_dim,), dtype=jnp.float32) * 0.02

    # Reference: plain-JAX strided conv (== nn.Conv2d(kernel=P, stride=P)).
    y_ref = jax.lax.conv_general_dilated(
        x, conv_weight, window_strides=(P, P), padding="VALID",
        dimension_numbers=("NCHW", "OIHW", "NCHW"),
    ) + conv_bias.reshape(1, embed_dim, 1, 1)

    # Default path: bf16 streamed operands, f32 accumulate, NCHW output.
    y_bf16 = patch_embed_pallas(x, conv_weight, conv_bias, P)
    y_bf16 = jax.block_until_ready(y_bf16)
    assert y_bf16.shape == (B, embed_dim, H // P, W // P), y_bf16.shape
    assert jnp.allclose(y_bf16, y_ref, atol=3e-2, rtol=3e-2)

    # Full-precision path (exact nn.Conv2d semantics).
    y_f32 = patch_embed_pallas(x, conv_weight, conv_bias, P, compute_dtype=None)
    y_f32 = jax.block_until_ready(y_f32)
    assert jnp.allclose(y_f32, y_ref, atol=1e-4, rtol=1e-4)

    # Transformer-ready (B, num_patches, D) output, skipping the NCHW round-trip.
    y_seq = patch_embed_pallas(x, conv_weight, conv_bias, P, return_nchw=False)
    y_seq = jax.block_until_ready(y_seq)
    assert y_seq.shape == (B, (H // P) * (W // P), embed_dim)
    assert jnp.allclose(
        y_seq, y_ref.reshape(B, embed_dim, -1).transpose(0, 2, 1),
        atol=3e-2, rtol=3e-2)

    print("KERNEL_OK")
</pallas_src>

<mosaic_0001>
module attributes {stable_mosaic.version = 11 : i64} {
  func.func @_patch_embed_kernel(%arg0: i32, %arg1: memref<32x128xbf16, #tpu.memory_space<vmem>>, %arg2: memref<128x128xbf16, #tpu.memory_space<vmem>>, %arg3: memref<1x128xf32, #tpu.memory_space<vmem>>, %arg4: memref<32x128xf32, #tpu.memory_space<vmem>>) attributes {dimension_semantics = [#tpu.dimension_semantics<parallel>], iteration_bounds = array<i64: 1>, scalar_prefetch = 0 : i64, scratch_operands = 0 : i64, tpu.core_type = #tpu.core_type<tc>, window_params = [{transform_indices = @transform_0, window_bounds = array<i64: 32, 128>}, {pipeline_mode = #tpu.pipeline_mode<synchronous>, transform_indices = @transform_1, window_bounds = array<i64: 128, 128>}, {pipeline_mode = #tpu.pipeline_mode<synchronous>, transform_indices = @transform_2, window_bounds = array<i64: 1, 128>}, {transform_indices = @transform_3, window_bounds = array<i64: 32, 128>}]} {
    %c0 = arith.constant 0 : index
    %c0_0 = arith.constant 0 : index
    %0 = vector.load %arg1[%c0, %c0_0] : memref<32x128xbf16, #tpu.memory_space<vmem>>, vector<32x128xbf16>
    %c0_1 = arith.constant 0 : index
    %c0_2 = arith.constant 0 : index
    %1 = vector.load %arg2[%c0_1, %c0_2] : memref<128x128xbf16, #tpu.memory_space<vmem>>, vector<128x128xbf16>
    %cst = arith.constant dense<0.000000e+00> : vector<32x128xf32>
    %2 = tpu.matmul %0, %1, %cst {dimension_numbers = #tpu.dot_dimension_numbers<[1], [0], [0], [1], [0, 0, 1, 1], [], []>} : vector<32x128xbf16>, vector<128x128xbf16>, vector<32x128xf32> -> vector<32x128xf32>
    %c0_3 = arith.constant 0 : index
    %c0_4 = arith.constant 0 : index
    %3 = vector.load %arg3[%c0_3, %c0_4] : memref<1x128xf32, #tpu.memory_space<vmem>>, vector<1x128xf32>
    %4 = vector.broadcast %3 : vector<1x128xf32> to vector<32x128xf32>
    %5 = arith.addf %2, %4 : vector<32x128xf32>
    %c0_5 = arith.constant 0 : index
    %c0_6 = arith.constant 0 : index
    %6 = vector.load %arg4[%c0_5, %c0_6] : memref<32x128xf32, #tpu.memory_space<vmem>>, vector<32x128xf32>
    tpu.vector_store %arg4[%c0_5, %c0_6], %5 {strides = array<i32>} : memref<32x128xf32, #tpu.memory_space<vmem>>, vector<32x128xf32>,
    return
  }
  func.func @transform_0(%arg0: i32) -> (i32, i32) {
    %c0_i32 = arith.constant 0 : i32
    %c0_i32_0 = arith.constant 0 : i32
    return %arg0, %c0_i32 : i32, i32
  }
  func.func @transform_1(%arg0: i32) -> (i32, i32) {
    %c0_i32 = arith.constant 0 : i32
    %c0_i32_0 = arith.constant 0 : i32
    %c0_i32_1 = arith.constant 0 : i32
    return %c0_i32, %c0_i32_0 : i32, i32
  }
  func.func @transform_2(%arg0: i32) -> (i32, i32) {
    %c0_i32 = arith.constant 0 : i32
    %c0_i32_0 = arith.constant 0 : i32
    %c0_i32_1 = arith.constant 0 : i32
    return %c0_i32, %c0_i32_0 : i32, i32
  }
  func.func @transform_3(%arg0: i32) -> (i32, i32) {
    %c0_i32 = arith.constant 0 : i32
    %c0_i32_0 = arith.constant 0 : i32
    return %arg0, %c0_i32 : i32, i32
  }
}

</mosaic_0001>

<bundles_post_ra>
// kernel: tpu_custom_call.1
= control target key start
LH: loop header
LB: loop body
LE: loop exit
PB: predicated region body
PF: predicated region fallthrough
CT: control target
= control target key end

     0   :  { %8 = vsyncpa [#allocation3], 0  ;;  %s398_s0 = inlined_call_operand.hbm [shape: bf16[32,128], index: 0, kind: input, shape index: {}]   ;;  %s399_s1 = inlined_call_operand.hbm [shape: bf16[128,128], index: 1, kind: input, shape index: {}]   ;;  %s400_s2 = inlined_call_operand.vmem [shape: f32[1,128], index: 2, kind: input, shape index: {}]   ;;  %s401_s3 = inlined_call_operand.hbm [shape: f32[32,128], index: 3, kind: output, shape index: {}]  }
   0x1   :  { %9 = vsyncpa [#allocation6], 0 }
   0x2   :  { %10 = vsyncpa [#allocation4], 0  ;;  %s332_s12 = smov [#allocation2]   ;;  %s260_s16 = scalar_lea.hbm %s398_s0, 256 }
   0x3   :  { %s16_s13 = sshll.u32 %s332_s12, 4  ;;  %p261_p0 = scmp.ne.s32.totalorder %s398_s0, %s260_s16  ;;  %s17_s13 = int_to_ptr.vmem [resolvable:$true] %s16_s13 }
   0x4   :  { %p264_p1 = scmp.lt.u32.totalorder %s260_s16, %s398_s0 }
   0x6   :  { %p266_p2 = pnand %p264_p1, %p261_p0 }
   0x8   :  { %269 = shalt.err (!%p266_p2)
}
   0x9   :  { %s270_s21 = scalar_lea.vmem %s17_s13, 256  ;;  %p275_p4 = scmp.lt.s32.totalorder %s17_s13, %s17_s13 }
   0xa   :  { %p271_p3 = scmp.ne.s32.totalorder %s17_s13, %s270_s21  ;;  %p276_p5 = scmp.lt.s32.totalorder %s270_s21, %s270_s21 }
   0xc   :  { %p277_p6 = por %p276_p5, %p275_p4 }
   0xe   :  { %p278_p7 = pnand %p277_p6, %p271_p3 }
  0x10   :  { %281 = shalt.err (!%p278_p7)
}
  0x11   :  { %s333_s22 = smov 64   ;;  %s334_s23 = smov 4  }
  0x12   :  { %22 = dma.hbm_to_vmem [thread:$0]  %s398_s0, 256, %s17_s13, [#allocation3], %s333_s22, %s333_s22, %s334_s23  }
  0x13   :  { %s335_s26 = smov [#allocation5]   ;;  %s282_s30 = scalar_lea.hbm %s399_s1, 1024 }
  0x14   :  { %s28_s27 = sshll.u32 %s335_s26, 4  ;;  %p283_p8 = scmp.ne.s32.totalorder %s399_s1, %s282_s30  ;;  %s29_s27 = int_to_ptr.vmem [resolvable:$true] %s28_s27 }
  0x15   :  { %p286_p9 = scmp.lt.u32.totalorder %s282_s30, %s399_s1 }
  0x17   :  { %p288_p10 = pnand %p286_p9, %p283_p8 }
  0x19   :  { %291 = shalt.err (!%p288_p10)
}
  0x1a   :  { %s292_s8 = scalar_lea.vmem %s29_s27, 1024  ;;  %p297_p12 = scmp.lt.s32.totalorder %s29_s27, %s29_s27 }
  0x1b   :  { %p293_p11 = scmp.ne.s32.totalorder %s29_s27, %s292_s8  ;;  %p298_p13 = scmp.lt.s32.totalorder %s292_s8, %s292_s8 }
  0x1d   :  { %p299_p0 = por %p298_p13, %p297_p12 }
  0x1f   :  { %p300_p1 = pnand %p299_p0, %p293_p11 }
  0x21   :  { %303 = shalt.err (!%p300_p1)
}
  0x22   :  { %34 = dma.hbm_to_vmem [thread:$0]  %s399_s1, 1024, %s29_s27, [#allocation6], %s333_s22, %s333_s22, %s334_s23  }
  0x23   :  { %326 = dma.done.wait [#allocation3], 256  }
  0x24   :  { %327 = vsyncadd [#allocation3], 4294967040 }
  0x25   :  { %328 = dma.done.wait [#allocation6], 1024  }
  0x26   :  { %329 = vsyncadd [#allocation6], 4294966272  ;;  %v250_v0 = vld [vmem:[#allocation5] sm:$0xff]   ;;  %v251_v1 = vld [vmem:[#allocation5 + $0x8] sm:$0xff]   ;;  %s336_s11 = smov [#allocation7]  }
  0x27   :  { %223 = vmatprep.subr.bf16.mxu0 %v250_v0  ;;  %v252_v2 = vld [vmem:[#allocation5 + $0x10] sm:$0xff]   ;;  %v253_v3 = vld [vmem:[#allocation5 + $0x18] sm:$0xff]   ;;  %v254_v5 = vld [vmem:[#allocation5 + $0x20] sm:$0xff]   ;;  %s189_s12 = sshll.u32 %s336_s11, 4  ;;  %s190_s12 = int_to_ptr.vmem [resolvable:$true] %s189_s12 }
  0x28   :  { %224 = vmatpush3.bf16.msra.mxu0 %v250_v0  ;;  %v258_v4 = vld [vmem:[#allocation2] sm:$0xff]   ;;  %v255_v6 = vld [vmem:[#allocation5 + $0x28] sm:$0xff]   ;;  %v257_v8 = vld [vmem:[#allocation5 + $0x38] sm:$0xff]   ;;  %s304_s13 = scalar_lea.vmem %s190_s12, 512  ;;  %p309_p3 = scmp.lt.s32.totalorder %s190_s12, %s190_s12 }
  0x29   :  { %225 = vmatprep.subr.bf16.mxu0 %v251_v1  ;;  %239 = vmatprep.mubr.bf16.mxu0 %v258_v4  ;;  %v256_v7 = vld [vmem:[#allocation5 + $0x30] sm:$0xff]   ;;  %v259_v9 = vld [vmem:[#allocation2 + $0x8] sm:$0xff]   ;;  %p305_p2 = scmp.ne.s32.totalorder %s190_s12, %s304_s13  ;;  %p310_p4 = scmp.lt.s32.totalorder %s304_s13, %s304_s13 }
  0x2a   :  { %v202_v10 = vld [vmem:[%s400_s2] ss:$0 sm:$0xff] }
  0x2b   :  { %p311_p5 = por %p310_p4, %p309_p3 }
  0x2c   :  { %226 = vmatpush3.bf16.msra.mxu0 %v251_v1 }
  0x2d   :  { %227 = vmatprep.subr.bf16.mxu0 %v252_v2  ;;  %p312_p6 = pnand %p311_p5, %p305_p2 }
  0x30   :  { %228 = vmatpush3.bf16.msra.mxu0 %v252_v2 }
  0x31   :  { %229 = vmatprep.subr.bf16.mxu0 %v253_v3 }
  0x34   :  { %230 = vmatpush3.bf16.msra.mxu0 %v253_v3 }
  0x35   :  { %231 = vmatprep.subr.bf16.mxu0 %v254_v5 }
  0x38   :  { %232 = vmatpush3.bf16.msra.mxu0 %v254_v5 }
  0x39   :  { %233 = vmatprep.subr.bf16.mxu0 %v255_v6 }
  0x3c   :  { %234 = vmatpush3.bf16.msra.mxu0 %v255_v6 }
  0x3d   :  { %235 = vmatprep.subr.bf16.mxu0 %v256_v7 }
  0x40   :  { %236 = vmatpush3.bf16.msra.mxu0 %v256_v7 }
  0x41   :  { %237 = vmatprep.subr.bf16.mxu0 %v257_v8 }
  0x44   :  { %238 = vmatpush3.bf16.msra.mxu0 %v257_v8 }
  0x47   :  { %240 = vmatmul.mubr.bf16.vlgmr.msra.gmra.mrb[0].mxu0 %v259_v9 }
 0x11a   :  { %v241_v11 = vpop.f32.mrb[0].mxu0 }
 0x11b   :  { %v174_v12 = vadd.f32 %v241_v11, %v202_v10  ;;  %v165_v13 = vpop.f32.mrb[1].mxu0 }
 0x11c   :  { %v166_v14 = vadd.f32 %v202_v10, %v165_v13  ;;  %v242_v15 = vpop.f32.mrb[2].mxu0 }
 0x11d   :  { %182 = vst [vmem:[#allocation7 + $0x10] sm:$0xff] %v174_v12  ;;  %v177_v16 = vadd.f32 %v242_v15, %v202_v10  ;;  %v168_v17 = vpop.f32.mrb[3].mxu0 }
 0x11e   :  { %180 = vst [vmem:[#allocation7] sm:$0xff] %v166_v14  ;;  %v169_v18 = vadd.f32 %v202_v10, %v168_v17 }
 0x11f   :  { %183 = vst [vmem:[#allocation7 + $0x18] sm:$0xff] %v177_v16 }
 0x120   :  { %181 = vst [vmem:[#allocation7 + $0x8] sm:$0xff] %v169_v18 }
 0x121   :  { %315 = shalt.err (!%p312_p6)
}
 0x122   :  { %s316_s15 = scalar_lea.hbm %s401_s3, 512 }
 0x123   :  { %p317_p7 = scmp.ne.s32.totalorder %s401_s3, %s316_s15  ;;  %p320_p8 = scmp.lt.u32.totalorder %s316_s15, %s401_s3 }
 0x125   :  { %p322_p9 = pnand %p320_p8, %p317_p7 }
 0x127   :  { %325 = shalt.err (!%p322_p9)
}
 0x128   :  { %s337_s20 = smov 128   ;;  %s338_s21 = smov 8  }
 0x129   :  { %195 = dma.vmem_to_hbm [thread:$0]  %s190_s12, 512, %s401_s3, [#allocation4], %s337_s20, %s337_s20, %s338_s21  }
 0x12a   :  { %330 = dma.done.wait [#allocation4], 512  }
 0x12b   :  { %331 = vsyncadd [#allocation4], 4294966784 }
 0x12c   :  { %199 = vsyncpa [#allocation3], 1 }
 0x12d   :  { %200 = vsyncpa [#allocation6], 1 }
 0x12e   :  { %201 = vsyncpa [#allocation4], 1 }

</bundles_post_ra>
